<compile_context>
chip_gen: v7x
topology: tpu7x:2x2x1
jax: 0.10.0
libtpu: 0.0.40
codegen_flags: <defaults>
</compile_context>

<pallas_src>
import functools
import math

import jax
import jax.numpy as jnp
from jax import lax
from jax.experimental import pallas as pl
from jax.experimental.pallas import tpu as pltpu


def _round_up(x, m):
    return ((x + m - 1) // m) * m


def _vmem_limit_bytes(estimate):
    # 2x headroom over the double-buffered working set; above the scoped
    # defaults (16 MiB v5e / 32 MiB v6e,v7x) but capped well under v7x's 64 MiB.
    return int(min(48 * 1024 * 1024, max(32 * 1024 * 1024, 2 * estimate)))


# ---------------------------------------------------------------------------
# Stage 1: fused packed Q/K/V projections (computed exactly once per row).
# ---------------------------------------------------------------------------
def _qkv_proj_kernel(xq_ref, xk_ref, xv_ref,
                     wq_ref, bq_ref, wk_ref, bk_ref, wv_ref, bv_ref,
                     q_ref, k_ref, v_ref):
    xq = xq_ref[0]                      # (rows, D) in compute dtype
    xk = xk_ref[0]
    xv = xv_ref[0]
    # Lane-dense (rows, D) @ (D, H*DH) on the MXU with f32 accumulation; the
    # bias add stays f32; a single downcast to the storage dtype afterwards.
    # wq/bq already carry the folded 1/sqrt(d_k).
    q = jnp.dot(xq, wq_ref[...], preferred_element_type=jnp.float32) + bq_ref[...]
    k = jnp.dot(xk, wk_ref[...], preferred_element_type=jnp.float32) + bk_ref[...]
    v = jnp.dot(xv, wv_ref[...], preferred_element_type=jnp.float32) + bv_ref[...]
    q_ref[0] = q.astype(q_ref.dtype)
    k_ref[0] = k.astype(k_ref.dtype)
    v_ref[0] = v.astype(v_ref.dtype)


# ---------------------------------------------------------------------------
# Stage 2: flash attention over (block_q, block_kv) tiles, online softmax.
# ---------------------------------------------------------------------------
def _flash_attn_kernel(q_ref, k_ref, v_ref, o_ref,
                       m_sc, l_sc, acc_sc, *,
                       n_heads, d_head, n_true, n_pad, att_mask,
                       block_q, block_kv):
    qi = pl.program_id(1)
    ki = pl.program_id(2)

    @pl.when(ki == 0)
    def _init():
        m_sc[...] = jnp.full_like(m_sc, -jnp.inf)
        l_sc[...] = jnp.zeros_like(l_sc)
        acc_sc[...] = jnp.zeros_like(acc_sc)

    q_start = qi * block_q
    kv_start = ki * block_kv
    kv_padded = n_pad > n_true          # static python bool

    def _split_heads(x2d):              # (len, H*DH) -> (H, len, DH)
        return jnp.stack(
            [x2d[:, h * d_head:(h + 1) * d_head] for h in range(n_heads)],
            axis=0)

    def _compute():
        q = _split_heads(q_ref[0])      # (H, BQ, DH) compute dtype
        k = _split_heads(k_ref[0])      # (H, BK, DH)
        v = _split_heads(v_ref[0])      # (H, BK, DH)

        # Head-batched QK^T on the MXU, f32 accumulation (scale pre-folded).
        s = jnp.einsum('hqd,hkd->hqk', q, k,
                       preferred_element_type=jnp.float32)   # (H, BQ, BK)

        if att_mask or kv_padded:
            row = q_start + lax.broadcasted_iota(jnp.int32, (block_q, block_kv), 0)
            col = kv_start + lax.broadcasted_iota(jnp.int32, (block_q, block_kv), 1)
            if att_mask and kv_padded:
                masked = jnp.logical_or(col > row, col >= n_true)
            elif att_mask:
                masked = col > row
            else:
                masked = col >= n_true
            # One additive f32 bias shared by all heads (finite -> no NaNs).
            s = s + jnp.where(masked, -1e30, 0.0).astype(jnp.float32)[None]

        m_prev = m_sc[...]                                        # (H, BQ, 1)
        m_new = jnp.maximum(m_prev, jnp.max(s, axis=-1, keepdims=True))
        alpha = jnp.exp(m_prev - m_new)
        p = jnp.exp(s - m_new)
        l_sc[...] = alpha * l_sc[...] + jnp.sum(p, axis=-1, keepdims=True)
        acc_sc[...] = alpha * acc_sc[...] + jnp.einsum(
            'hqk,hkd->hqd', p.astype(v.dtype), v,
            preferred_element_type=jnp.float32)
        m_sc[...] = m_new

    if att_mask:
        # Tile-level causal skipping: KV tiles strictly above the diagonal.
        pl.when(kv_start <= q_start + block_q - 1)(_compute)
    else:
        _compute()

    @pl.when(ki == pl.num_programs(2) - 1)
    def _finalize():
        inv = pl.reciprocal(l_sc[...], approx=True)               # EUP slot
        out = acc_sc[...] * inv                                   # (H, BQ, DH)
        # Merge heads back to packed layout -> one lane-dense store.
        out = jnp.concatenate([out[h] for h in range(n_heads)], axis=-1)
        o_ref[0] = out.astype(o_ref.dtype)


class MultiheadedAttentionPallas:
    """Pallas-TPU version of the per-head-Linear MultiheadedAttention module."""

    def __init__(self, n, h, d_model, att_mask=False,
                 key=None, compute_dtype=jnp.bfloat16,
                 block_q=256, block_kv=256):
        if key is None:
            key = jax.random.PRNGKey(0)
        self.n = n
        self.h = h
        self.d_model = d_model
        self.d_head = d_model // h
        self.att_mask = att_mask
        self.compute_dtype = compute_dtype
        self.block_q = block_q
        self.block_kv = block_kv

        hdh = h * self.d_head
        bound = 1.0 / math.sqrt(d_model)          # nn.Linear-style init
        scale = 1.0 / math.sqrt(self.d_head)      # folded 1/sqrt(d_k)
        keys = jax.random.split(key, 6)

        # Packed weights: column block [h*DH:(h+1)*DH] is head h's W^T.
        self.wq = jax.random.uniform(keys[0], (d_model, hdh), jnp.float32,
                                     -bound, bound) * scale
        self.wk = jax.random.uniform(keys[1], (d_model, hdh), jnp.float32,
                                     -bound, bound)
        self.wv = jax.random.uniform(keys[2], (d_model, hdh), jnp.float32,
                                     -bound, bound)
        self.bq = jax.random.uniform(keys[3], (1, hdh), jnp.float32,
                                     -bound, bound) * scale
        self.bk = jax.random.uniform(keys[4], (1, hdh), jnp.float32,
                                     -bound, bound)
        self.bv = jax.random.uniform(keys[5], (1, hdh), jnp.float32,
                                     -bound, bound)

    def __call__(self, x_q, x_k, x_v):
        B, N, D = x_q.shape
        H, DH = self.h, self.d_head
        HDH = H * DH
        assert D == self.d_model

        # Bounded tiles independent of N; pad N up to a tile multiple and mask
        # the padded KV columns (never a quadratic (N, N) score block).
        blk_q = self.block_q if N >= self.block_q else _round_up(N, 8)
        blk_kv = self.block_kv if N >= self.block_kv else _round_up(N, 8)
        lcm = blk_q * blk_kv // math.gcd(blk_q, blk_kv)
        n_pad = _round_up(N, lcm)

        if n_pad != N:
            pad = ((0, 0), (0, n_pad - N), (0, 0))
            x_q = jnp.pad(x_q, pad)
            x_k = jnp.pad(x_k, pad)
            x_v = jnp.pad(x_v, pad)

        cdt = self.compute_dtype
        csz = jnp.dtype(cdt).itemsize
        xq = x_q.astype(cdt)
        xk = x_k.astype(cdt)
        xv = x_v.astype(cdt)
        wq = self.wq.astype(cdt)
        wk = self.wk.astype(cdt)
        wv = self.wv.astype(cdt)

        # ---- Stage 1: packed Q/K/V projections (computed exactly once). ----
        row_in = pl.BlockSpec((1, blk_q, D), lambda b, r: (b, r, 0))
        row_out = pl.BlockSpec((1, blk_q, HDH), lambda b, r: (b, r, 0))
        w_spec = pl.BlockSpec((D, HDH), lambda b, r: (0, 0))
        b_spec = pl.BlockSpec((1, HDH), lambda b, r: (0, 0))

        proj_est = (3 * 2 * blk_q * D * csz        # x tiles (double-buffered)
                    + 3 * 2 * D * HDH * csz        # packed weights
                    + 3 * 2 * HDH * 4              # biases
                    + 3 * 2 * blk_q * HDH * csz)   # projected outputs
        proj_shape = jax.ShapeDtypeStruct((B, n_pad, HDH), cdt)

        q_p, k_p, v_p = pl.pallas_call(
            _qkv_proj_kernel,
            out_shape=(proj_shape, proj_shape, proj_shape),
            grid_spec=pltpu.PrefetchScalarGridSpec(
                num_scalar_prefetch=0,
                grid=(B, n_pad // blk_q),
                in_specs=[row_in, row_in, row_in,
                          w_spec, b_spec, w_spec, b_spec, w_spec, b_spec],
                out_specs=(row_out, row_out, row_out),
            ),
            compiler_params=pltpu.CompilerParams(
                dimension_semantics=("parallel", "parallel"),
                vmem_limit_bytes=_vmem_limit_bytes(proj_est)),
        )(xq, xk, xv, wq, self.bq, wk, self.bk, wv, self.bv)

        # ---- Stage 2: flash attention over (block_q, block_kv) tiles. ----
        num_q = n_pad // blk_q
        num_kv = n_pad // blk_kv
        attn_kernel = functools.partial(
            _flash_attn_kernel, n_heads=H, d_head=DH, n_true=N, n_pad=n_pad,
            att_mask=self.att_mask, block_q=blk_q, block_kv=blk_kv)

        attn_est = (2 * blk_q * HDH * csz          # q tile
                    + 2 * 2 * blk_kv * HDH * csz   # k, v tiles
                    + 2 * blk_q * HDH * 4          # f32 output tile
                    + 2 * H * blk_q * 4            # m, l stats
                    + H * blk_q * DH * 4)          # f32 accumulator

        out = pl.pallas_call(
            attn_kernel,
            out_shape=jax.ShapeDtypeStruct((B, n_pad, HDH), jnp.float32),
            grid_spec=pltpu.PrefetchScalarGridSpec(
                num_scalar_prefetch=0,
                grid=(B, num_q, num_kv),
                in_specs=[
                    pl.BlockSpec((1, blk_q, HDH), lambda b, qi, ki: (b, qi, 0)),
                    pl.BlockSpec((1, blk_kv, HDH), lambda b, qi, ki: (b, ki, 0)),
                    pl.BlockSpec((1, blk_kv, HDH), lambda b, qi, ki: (b, ki, 0)),
                ],
                out_specs=pl.BlockSpec((1, blk_q, HDH),
                                       lambda b, qi, ki: (b, qi, 0)),
                scratch_shapes=[
                    pltpu.VMEM((H, blk_q, 1), jnp.float32),    # running max
                    pltpu.VMEM((H, blk_q, 1), jnp.float32),    # running sum
                    pltpu.VMEM((H, blk_q, DH), jnp.float32),   # output accum
                ],
            ),
            compiler_params=pltpu.CompilerParams(
                dimension_semantics=("parallel", "parallel", "arbitrary"),
                vmem_limit_bytes=_vmem_limit_bytes(attn_est)),
        )(q_p, k_p, v_p)

        # Output already in torch.cat(heads, dim=-1) layout: (B, N, H*DH).
        return out[:, :N, :] if n_pad != N else out

    # Pure-JAX reference (f32) for correctness checking.
    def reference(self, x_q, x_k, x_v):
        B, N, D = x_q.shape
        H, DH = self.h, self.d_head

        def proj(x, w, b):
            return (x @ w + b).reshape(B, N, H, DH)

        q = proj(x_q, self.wq, self.bq)       # wq/bq already carry 1/sqrt(d_k)
        k = proj(x_k, self.wk, self.bk)
        v = proj(x_v, self.wv, self.bv)
        s = jnp.einsum("bqhd,bkhd->bhqk", q, k)
        if self.att_mask:
            row = jnp.arange(N)[:, None]
            col = jnp.arange(N)[None, :]
            s = jnp.where(col > row, -jnp.inf, s)
        p = jax.nn.softmax(s, axis=-1)
        o = jnp.einsum("bhqk,bkhd->bqhd", p, v)
        return o.reshape(B, N, H * DH)


if __name__ == "__main__":
    B, D_MODEL, H = 2, 32, 4
    key = jax.random.PRNGKey(0)
    kq, kk, kv, kp = jax.random.split(key, 4)

    ok = True
    # N=8 (exact tiles) plus N=12 (exercises the padded / masked KV tail).
    for N in (8, 12):
        x_q = jax.random.normal(kq, (B, N, D_MODEL), jnp.float32)
        x_k = jax.random.normal(kk, (B, N, D_MODEL), jnp.float32)
        x_v = jax.random.normal(kv, (B, N, D_MODEL), jnp.float32)
        for att_mask in (False, True):
            for cdt, tol in ((jnp.float32, 5e-3), (jnp.bfloat16, 5e-2)):
                mha = MultiheadedAttentionPallas(n=N, h=H, d_model=D_MODEL,
                                                 att_mask=att_mask, key=kp,
                                                 compute_dtype=cdt)
                out = mha(x_q, x_k, x_v)
                jax.block_until_ready(out)
                ref = mha.reference(x_q, x_k, x_v)
                assert out.shape == (B, N, D_MODEL)
                ok = ok and bool(jnp.allclose(out, ref, atol=tol, rtol=tol))

    print("KERNEL_OK" if ok else "MISMATCH")
</pallas_src>

<mosaic_0001>
module attributes {stable_mosaic.version = 11 : i64} {
  func.func @_qkv_proj_kernel(%arg0: i32, %arg1: i32, %arg2: memref<1x8x32xf32, #tpu.memory_space<vmem>>, %arg3: memref<1x8x32xf32, #tpu.memory_space<vmem>>, %arg4: memref<1x8x32xf32, #tpu.memory_space<vmem>>, %arg5: memref<32x32xf32, #tpu.memory_space<vmem>>, %arg6: memref<1x32xf32, #tpu.memory_space<vmem>>, %arg7: memref<32x32xf32, #tpu.memory_space<vmem>>, %arg8: memref<1x32xf32, #tpu.memory_space<vmem>>, %arg9: memref<32x32xf32, #tpu.memory_space<vmem>>, %arg10: memref<1x32xf32, #tpu.memory_space<vmem>>, %arg11: memref<1x8x32xf32, #tpu.memory_space<vmem>>, %arg12: memref<1x8x32xf32, #tpu.memory_space<vmem>>, %arg13: memref<1x8x32xf32, #tpu.memory_space<vmem>>) attributes {dimension_semantics = [#tpu.dimension_semantics<parallel>, #tpu.dimension_semantics<parallel>], iteration_bounds = array<i64: 2, 1>, scalar_prefetch = 0 : i64, scratch_operands = 0 : i64, tpu.core_type = #tpu.core_type<tc>, window_params = [{transform_indices = @transform_0, window_bounds = array<i64: 1, 8, 32>}, {transform_indices = @transform_1, window_bounds = array<i64: 1, 8, 32>}, {transform_indices = @transform_2, window_bounds = array<i64: 1, 8, 32>}, {pipeline_mode = #tpu.pipeline_mode<synchronous>, transform_indices = @transform_3, window_bounds = array<i64: 32, 32>}, {pipeline_mode = #tpu.pipeline_mode<synchronous>, transform_indices = @transform_4, window_bounds = array<i64: 1, 32>}, {pipeline_mode = #tpu.pipeline_mode<synchronous>, transform_indices = @transform_5, window_bounds = array<i64: 32, 32>}, {pipeline_mode = #tpu.pipeline_mode<synchronous>, transform_indices = @transform_6, window_bounds = array<i64: 1, 32>}, {pipeline_mode = #tpu.pipeline_mode<synchronous>, transform_indices = @transform_7, window_bounds = array<i64: 32, 32>}, {pipeline_mode = #tpu.pipeline_mode<synchronous>, transform_indices = @transform_8, window_bounds = array<i64: 1, 32>}, {transform_indices = @transform_9, window_bounds = array<i64: 1, 8, 32>}, {transform_indices = @transform_10, window_bounds = array<i64: 1, 8, 32>}, {transform_indices = @transform_11, window_bounds = array<i64: 1, 8, 32>}]} {
    %c0 = arith.constant 0 : index
    %c0_0 = arith.constant 0 : index
    %c0_1 = arith.constant 0 : index
    %0 = vector.load %arg2[%c0, %c0_0, %c0_1] : memref<1x8x32xf32, #tpu.memory_space<vmem>>, vector<1x8x32xf32>
    %1 = vector.shape_cast %0 : vector<1x8x32xf32> to vector<8x32xf32>
    %c0_2 = arith.constant 0 : index
    %c0_3 = arith.constant 0 : index
    %c0_4 = arith.constant 0 : index
    %2 = vector.load %arg3[%c0_2, %c0_3, %c0_4] : memref<1x8x32xf32, #tpu.memory_space<vmem>>, vector<1x8x32xf32>
    %3 = vector.shape_cast %2 : vector<1x8x32xf32> to vector<8x32xf32>
    %c0_5 = arith.constant 0 : index
    %c0_6 = arith.constant 0 : index
    %c0_7 = arith.constant 0 : index
    %4 = vector.load %arg4[%c0_5, %c0_6, %c0_7] : memref<1x8x32xf32, #tpu.memory_space<vmem>>, vector<1x8x32xf32>
    %5 = vector.shape_cast %4 : vector<1x8x32xf32> to vector<8x32xf32>
    %c0_8 = arith.constant 0 : index
    %c0_9 = arith.constant 0 : index
    %6 = vector.load %arg5[%c0_8, %c0_9] : memref<32x32xf32, #tpu.memory_space<vmem>>, vector<32x32xf32>
    %cst = arith.constant dense<0.000000e+00> : vector<8x32xf32>
    %7 = tpu.matmul %1, %6, %cst {dimension_numbers = #tpu.dot_dimension_numbers<[1], [0], [0], [1], [0, 0, 1, 1], [], []>} : vector<8x32xf32>, vector<32x32xf32>, vector<8x32xf32> -> vector<8x32xf32>
    %c0_10 = arith.constant 0 : index
    %c0_11 = arith.constant 0 : index
    %8 = vector.load %arg6[%c0_10, %c0_11] : memref<1x32xf32, #tpu.memory_space<vmem>>, vector<1x32xf32>
    %9 = vector.broadcast %8 : vector<1x32xf32> to vector<8x32xf32>
    %10 = arith.addf %7, %9 : vector<8x32xf32>
    %c0_12 = arith.constant 0 : index
    %c0_13 = arith.constant 0 : index
    %11 = vector.load %arg7[%c0_12, %c0_13] : memref<32x32xf32, #tpu.memory_space<vmem>>, vector<32x32xf32>
    %cst_14 = arith.constant dense<0.000000e+00> : vector<8x32xf32>
    %12 = tpu.matmul %3, %11, %cst_14 {dimension_numbers = #tpu.dot_dimension_numbers<[1], [0], [0], [1], [0, 0, 1, 1], [], []>} : vector<8x32xf32>, vector<32x32xf32>, vector<8x32xf32> -> vector<8x32xf32>
    %c0_15 = arith.constant 0 : index
    %c0_16 = arith.constant 0 : index
    %13 = vector.load %arg8[%c0_15, %c0_16] : memref<1x32xf32, #tpu.memory_space<vmem>>, vector<1x32xf32>
    %14 = vector.broadcast %13 : vector<1x32xf32> to vector<8x32xf32>
    %15 = arith.addf %12, %14 : vector<8x32xf32>
    %c0_17 = arith.constant 0 : index
    %c0_18 = arith.constant 0 : index
    %16 = vector.load %arg9[%c0_17, %c0_18] : memref<32x32xf32, #tpu.memory_space<vmem>>, vector<32x32xf32>
    %cst_19 = arith.constant dense<0.000000e+00> : vector<8x32xf32>
    %17 = tpu.matmul %5, %16, %cst_19 {dimension_numbers = #tpu.dot_dimension_numbers<[1], [0], [0], [1], [0, 0, 1, 1], [], []>} : vector<8x32xf32>, vector<32x32xf32>, vector<8x32xf32> -> vector<8x32xf32>
    %c0_20 = arith.constant 0 : index
    %c0_21 = arith.constant 0 : index
    %18 = vector.load %arg10[%c0_20, %c0_21] : memref<1x32xf32, #tpu.memory_space<vmem>>, vector<1x32xf32>
    %19 = vector.broadcast %18 : vector<1x32xf32> to vector<8x32xf32>
    %20 = arith.addf %17, %19 : vector<8x32xf32>
    %c0_22 = arith.constant 0 : index
    %c0_23 = arith.constant 0 : index
    %c0_24 = arith.constant 0 : index
    %21 = vector.load %arg11[%c0_22, %c0_23, %c0_24] : memref<1x8x32xf32, #tpu.memory_space<vmem>>, vector<1x8x32xf32>
    %22 = vector.shape_cast %21 : vector<1x8x32xf32> to vector<8x32xf32>
    %23 = vector.shape_cast %10 : vector<8x32xf32> to vector<1x8x32xf32>
    tpu.vector_store %arg11[%c0_22, %c0_23, %c0_24], %23 {strides = array<i32>} : memref<1x8x32xf32, #tpu.memory_space<vmem>>, vector<1x8x32xf32>,
    %c0_25 = arith.constant 0 : index
    %c0_26 = arith.constant 0 : index
    %c0_27 = arith.constant 0 : index
    %24 = vector.load %arg12[%c0_25, %c0_26, %c0_27] : memref<1x8x32xf32, #tpu.memory_space<vmem>>, vector<1x8x32xf32>
    %25 = vector.shape_cast %24 : vector<1x8x32xf32> to vector<8x32xf32>
    %26 = vector.shape_cast %15 : vector<8x32xf32> to vector<1x8x32xf32>
    tpu.vector_store %arg12[%c0_25, %c0_26, %c0_27], %26 {strides = array<i32>} : memref<1x8x32xf32, #tpu.memory_space<vmem>>, vector<1x8x32xf32>,
    %c0_28 = arith.constant 0 : index
    %c0_29 = arith.constant 0 : index
    %c0_30 = arith.constant 0 : index
    %27 = vector.load %arg13[%c0_28, %c0_29, %c0_30] : memref<1x8x32xf32, #tpu.memory_space<vmem>>, vector<1x8x32xf32>
    %28 = vector.shape_cast %27 : vector<1x8x32xf32> to vector<8x32xf32>
    %29 = vector.shape_cast %20 : vector<8x32xf32> to vector<1x8x32xf32>
    tpu.vector_store %arg13[%c0_28, %c0_29, %c0_30], %29 {strides = array<i32>} : memref<1x8x32xf32, #tpu.memory_space<vmem>>, vector<1x8x32xf32>,
    return
  }
  func.func @transform_0(%arg0: i32, %arg1: i32) -> (i32, i32, i32) {
    %c0_i32 = arith.constant 0 : i32
    %c0_i32_0 = arith.constant 0 : i32
    return %arg0, %arg1, %c0_i32 : i32, i32, i32
  }
  func.func @transform_1(%arg0: i32, %arg1: i32) -> (i32, i32, i32) {
    %c0_i32 = arith.constant 0 : i32
    %c0_i32_0 = arith.constant 0 : i32
    return %arg0, %arg1, %c0_i32 : i32, i32, i32
  }
  func.func @transform_2(%arg0: i32, %arg1: i32) -> (i32, i32, i32) {
    %c0_i32 = arith.constant 0 : i32
    %c0_i32_0 = arith.constant 0 : i32
    return %arg0, %arg1, %c0_i32 : i32, i32, i32
  }
  func.func @transform_3(%arg0: i32, %arg1: i32) -> (i32, i32) {
    %c0_i32 = arith.constant 0 : i32
    %c0_i32_0 = arith.constant 0 : i32
    %c0_i32_1 = arith.constant 0 : i32
    return %c0_i32, %c0_i32_0 : i32, i32
  }
  func.func @transform_4(%arg0: i32, %arg1: i32) -> (i32, i32) {
    %c0_i32 = arith.constant 0 : i32
    %c0_i32_0 = arith.constant 0 : i32
    %c0_i32_1 = arith.constant 0 : i32
    return %c0_i32, %c0_i32_0 : i32, i32
  }
  func.func @transform_5(%arg0: i32, %arg1: i32) -> (i32, i32) {
    %c0_i32 = arith.constant 0 : i32
    %c0_i32_0 = arith.constant 0 : i32
    %c0_i32_1 = arith.constant 0 : i32
    return %c0_i32, %c0_i32_0 : i32, i32
  }
  func.func @transform_6(%arg0: i32, %arg1: i32) -> (i32, i32) {
    %c0_i32 = arith.constant 0 : i32
    %c0_i32_0 = arith.constant 0 : i32
    %c0_i32_1 = arith.constant 0 : i32
    return %c0_i32, %c0_i32_0 : i32, i32
  }
  func.func @transform_7(%arg0: i32, %arg1: i32) -> (i32, i32) {
    %c0_i32 = arith.constant 0 : i32
    %c0_i32_0 = arith.constant 0 : i32
    %c0_i32_1 = arith.constant 0 : i32
    return %c0_i32, %c0_i32_0 : i32, i32
  }
  func.func @transform_8(%arg0: i32, %arg1: i32) -> (i32, i32) {
    %c0_i32 = arith.constant 0 : i32
    %c0_i32_0 = arith.constant 0 : i32
    %c0_i32_1 = arith.constant 0 : i32
    return %c0_i32, %c0_i32_0 : i32, i32
  }
  func.func @transform_9(%arg0: i32, %arg1: i32) -> (i32, i32, i32) {
    %c0_i32 = arith.constant 0 : i32
    %c0_i32_0 = arith.constant 0 : i32
    return %arg0, %arg1, %c0_i32 : i32, i32, i32
  }
  func.func @transform_10(%arg0: i32, %arg1: i32) -> (i32, i32, i32) {
    %c0_i32 = arith.constant 0 : i32
    %c0_i32_0 = arith.constant 0 : i32
    return %arg0, %arg1, %c0_i32 : i32, i32, i32
  }
  func.func @transform_11(%arg0: i32, %arg1: i32) -> (i32, i32, i32) {
    %c0_i32 = arith.constant 0 : i32
    %c0_i32_0 = arith.constant 0 : i32
    return %arg0, %arg1, %c0_i32 : i32, i32, i32
  }
}

</mosaic_0001>

<bundles_post_ra>
// kernel: tpu_custom_call.1
= control target key start
LH: loop header
LB: loop body
LE: loop exit
PB: predicated region body
PF: predicated region fallthrough
CT: control target
= control target key end

     0   :  { %s2149_s0 = inlined_call_operand.hbm [shape: f32[2,8,32], index: 0, kind: input, shape index: {}]   ;;  %s2150_s1 = inlined_call_operand.hbm [shape: f32[2,8,32], index: 1, kind: input, shape index: {}]   ;;  %s2151_s2 = inlined_call_operand.hbm [shape: f32[2,8,32], index: 2, kind: input, shape index: {}]   ;;  %s2152_s3 = inlined_call_operand.hbm [shape: f32[32,32], index: 3, kind: input, shape index: {}]   ;;  %s2153_s4 = inlined_call_operand.vmem [shape: f32[1,32], index: 4, kind: input, shape index: {}]   ;;  %s2154_s5 = inlined_call_operand.hbm [shape: f32[32,32], index: 5, kind: input, shape index: {}]   ;;  %s2155_s6 = inlined_call_operand.vmem [shape: f32[1,32], index: 6, kind: input, shape index: {}]   ;;  %s2156_s7 = inlined_call_operand.hbm [shape: f32[32,32], index: 7, kind: input, shape index: {}]   ;;  %s2157_s8 = inlined_call_operand.vmem [shape: f32[1,32], index: 8, kind: input, shape index: {}]   ;;  %s2158_s9 = inlined_call_operand.hbm [shape: f32[2,8,32], index: 9, kind: output, shape index: {0}]   ;;  %s2159_s10 = inlined_call_operand.hbm [shape: f32[2,8,32], index: 10, kind: output, shape index: {1}]   ;;  %s2160_s11 = inlined_call_operand.hbm [shape: f32[2,8,32], index: 11, kind: output, shape index: {2}]  }
   0x1   :  { %2190 = sst [smem:[#allocation30_spill]] %s2150_s1 }
   0x2   :  { %2191 = sst [smem:[#allocation31_spill]] %s2152_s3 }
   0x3   :  { %2192 = sst [smem:[#allocation32_spill]] %s2153_s4 }
   0x4   :  { %2193 = sst [smem:[#allocation33_spill]] %s2155_s6 }
   0x5   :  { %2194 = sst [smem:[#allocation34_spill]] %s2157_s8 }
   0x6   :  { %2195 = sst [smem:[#allocation35_spill]] %s2158_s9 }
   0x7   :  { %2196 = sst [smem:[#allocation36_spill]] %s2159_s10 }
   0x8   :  { %2197 = sst [smem:[#allocation37_spill]] %s2160_s11 }
   0x9   :  { %17 = vsyncpa [#allocation3], 0 }
   0xa   :  { %19 = vsyncpa [#allocation3 + $0x1], 0 }
   0xb   :  { %20 = vsyncpa [#allocation6], 0 }
   0xc   :  { %22 = vsyncpa [#allocation6 + $0x1], 0 }
   0xd   :  { %23 = vsyncpa [#allocation9], 0 }
   0xe   :  { %24 = vsyncpa [#allocation12], 0 }
   0xf   :  { %25 = vsyncpa [#allocation4], 0 }
  0x10   :  { %27 = vsyncpa [#allocation4 + $0x1], 0 }
  0x11   :  { %28 = vsyncpa [#allocation15], 0 }
  0x12   :  { %30 = vsyncpa [#allocation15 + $0x1], 0  ;;  %s1716_s17 = smov 0   ;;  %s1718_s18 = smov 0  }
  0x13   :  { %s1720_s19 = smov 0   ;;  %s1722_s20 = smov 0  }
  0x14   :  { %s1724_s21 = smov 0   ;;  %s1726_s22 = smov 0  }
  0x15 LB: > { %2198 = sst [smem:[#allocation23_spill]] %s1620_s17  ;;  %s1747_s23 = sadd.s32 4294967295, %s1640_s22   ;;  %s1640_s22 = sphi %s1726_s22, %s36_s22   ;;  %s1636_s21 = sphi %s1724_s21, %s2247_s21   ;;  %s1632_s20 = sphi %s1722_s20, %s2246_s20   ;;  %s1628_s19 = sphi %s1720_s19, %s2250_s19   ;;  %s1624_s18 = sphi %s1718_s18, %s2249_s18   ;;  %s1620_s17 = sphi %s1716_s17, %s2248_s17  }
  0x16   : > { %2199 = sst [smem:[#allocation24_spill]] %s1636_s21  ;;  %s2161_s24 = sadd.s32 4294967294, %s1640_s22  }
  0x17   : > { %2200 = sst [smem:[#allocation25_spill]] %s1640_s22  ;;  %p70_p0 = scmp.ne.s32.totalorder %s1624_s18, %s1620_s17 }
  0x18   : > { %p2164_p1 = scmp.eq.s32.totalorder %s1747_s23, 0  ;;  %p284_p3 = scmp.eq.s32.totalorder %s2161_s24, 1 }
  0x19   : > { %p1093_p5 = scmp.ge.s32.totalorder %s1640_s22, 1  ;;  %p347_p7 = scmp.lt.s32.totalorder %s1640_s22, 3 }
  0x1a   : > { %p1758_p4 = por %p2164_p1, %p70_p0  ;;  %p1763_p6 = por %p284_p3, %p70_p0 }
  0x1b   : > { %p1768_p8 = pnand %p1093_p5, %p347_p7  ;;  %s1642_s28 = smov [#allocation8]  }
  0x1c   : > { %s2201_s25 = scalar_select %p1758_p4, 1, 0 }
  0x1d   : > { %s2202_s26 = scalar_select %p1763_p6, 1, 0 }
  0x1e   : > { %s2204_s27 = scalar_select %p1768_p8, 1, 0 }
  0x1f   : > { %2203 = sst [smem:[#allocation26_spill]] %s2202_s26  ;;  %s359_s29 = sshll.u32 %s1642_s28, 4  ;;  %s360_s29 = int_to_ptr.vmem [resolvable:$true] %s359_s29 }
  0x20   : > { %p1218_p9 = pneg %p1768_p8  ;;  %s48_s12 = sadd.s32 1, %s1636_s21 }
  0x21   : > { %s2206_s3 = sld [smem:[#allocation31_spill]] }
  0x22   : > { %p1777_p11 = pnand %p1218_p9, %p2164_p1 }
  0x24   : > { %s2205_s30 = scalar_select %p1777_p11, 1, 0 }
  0x25   : > { %p1790_p13 = pneg %p1777_p11 }
  0x27   : > { %s1312_s15 = scalar_lea.hbm %s2206_s3, 512 }
  0x28   : > { %p1313_p12 = scmp.ne.s32.totalorder %s2206_s3, %s1312_s15  ;;  %p1319_p5 = scmp.lt.u32.totalorder %s1312_s15, %s2206_s3 }
  0x29   : > { %s2207_s28 = scalar_select %p1790_p13, 1, 0 }
  0x2a   : > { %p1315_p0 = pnand %p1790_p13, %p1313_p12 }
  0x2c   : > { %p1316_p3 = pneg %p1315_p0 }
  0x2e   : > { %p1321_p7 = pnand %p1319_p5, %p1316_p3 }
  0x30   : > { %1324 = shalt.err (!%p1321_p7)
}
  0x31   : > { %s1325_s13 = scalar_lea.vmem %s360_s29, 512  ;;  %p1333_p2 = scmp.lt.s32.totalorder %s360_s29, %s360_s29 }
  0x32   : > { %p1326_p9 = scmp.ne.s32.totalorder %s360_s29, %s1325_s13  ;;  %p1334_p6 = scmp.lt.s32.totalorder %s1325_s13, %s1325_s13 }
  0x34   : > { %p1328_p10 = pnand %p1326_p9, %p1790_p13  ;;  %p1335_p4 = por %p1334_p6, %p1333_p2 }
  0x36   : > { %p1329_p1 = pneg %p1328_p10 }
  0x38   : > { %p1336_p8 = pnand %p1335_p4, %p1329_p1 }
  0x3a   : > { %1339 = shalt.err (!%p1336_p8)
}
  0x3b   : > { %s2168_s24 = smov 128   ;;  %s2170_s17 = smov 8  }
  0x3c   : > { %1221 = dma.hbm_to_vmem [thread:$0]  (!%p1777_p11), %s2206_s3, 512, %s360_s29, [#allocation9], %s2168_s24, %s2168_s24, %s2170_s17  }
  0x3d   : > { %p50_p1 = scmp.ge.s32.totalorder %s48_s12, 2  ;;  %s57_s15 = sadd.s32 1, %s1628_s19 }
  0x3e   : > { %p64_p2 = scmp.ne.s32.totalorder %s1628_s19, %s1624_s18  ;;  %p65_p4 = scmp.eq.s32.totalorder %s1640_s22, 0 }
  0x3f   : > { %s2252_s12 = smov (%p50_p1, %s48_s12), 0  ;;  %p2209_p8 = scmp.eq.s32.totalorder %s1747_s23, 1 }
  0x40   : > { %2208 = sst [smem:[#allocation27_spill]] %s2252_s12  ;;  %p66_p6 = por %p65_p4, %p64_p2 }
  0x41   : > { %p1817_p10 = por %p2209_p8, %p64_p2  ;;  %s52_s13 = ssub.s32 %s1636_s21, %s2252_s12 }
  0x42   : > { %p1251_p12 = scmp.lt.s32.totalorder %s1640_s22, 2  ;;  %p55_p0 = scmp.eq.s32.totalorder %s52_s13, 0 }
  0x43   : > { %s2210_s16 = scalar_select %p1817_p10, 1, 0 }
  0x44   : > { %s2173_s11 = sand.u32 1, %s1628_s19   ;;  %s1830_s26 = sshll.u32 %s1636_s21, 7 }
  0x45   : > { %2211 = sst [smem:[#allocation28_spill]] %s2210_s16  ;;  %s1827_s29 = sshll.u32 %s2173_s11, 3 }
  0x46   : > { %s1833_s14 = scalar_select %p55_p0, %s1628_s19, %s57_s15  }
  0x47   : > { %p1835_p3 = pnand %p1251_p12, %p66_p6  ;;  %s427_s17 = sand.u32 1, %s1640_s22  }
  0x48   : > { %2212 = sst [smem:[#allocation29_spill]] %s1833_s14  ;;  %s2214_s1 = sld [smem:[#allocation30_spill]] }
  0x49   : > { %s2213_s24 = scalar_select %p1835_p3, 1, 0 }
  0x4a   : > { %s431_s11 = scalar_lea.vmem [#allocation5], %s1827_s29  ;;  %s1645_s15 = smov [#allocation10]  }
  0x4b   : > { %s439_s21 = sshll.u32 %s431_s11, 4  ;;  %s1849_s14 = sshll.u32 %s1645_s15, 4  ;;  %s1847_s21 = int_to_ptr.vmem [resolvable:$true] %s439_s21  ;;  %s376_s14 = int_to_ptr.vmem [resolvable:$true] %s1849_s14 }
  0x4c   : > { %s1851_s8 = scalar_lea.sflag [#allocation6], %s427_s17  ;;  %p1857_p7 = pneg %p1835_p3 }
  0x4e   : > { %s1844_s13 = scalar_lea.hbm %s2214_s1, %s1830_s26  ;;  %s1345_s22 = scalar_lea.hbm %s2214_s1, 256 }
  0x4f   : > { %s1340_s10 = scalar_lea.hbm %s1844_s13, 128  ;;  %p1346_p2 = scmp.lt.u32.totalorder %s1844_s13, %s2214_s1 }
  0x50   : > { %p1341_p5 = scmp.ne.s32.totalorder %s1844_s13, %s1340_s10  ;;  %p1347_p4 = scmp.lt.u32.totalorder %s1345_s22, %s1340_s10 }
  0x51   : > { %s2215_s3 = scalar_select %p1857_p7, 1, 0 }
  0x52   : > { %p1343_p9 = pnand %p1857_p7, %p1341_p5  ;;  %p1348_p6 = por %p1347_p4, %p1346_p2 }
  0x53   : > { %p1349_p8 = scmp.lt.u32.totalorder %s1340_s10, %s1844_s13 }
  0x54   : > { %p1344_p1 = pneg %p1343_p9 }
  0x55   : > { %p1350_p12 = por %p1349_p8, %p1348_p6 }
  0x57   : > { %p1351_p0 = pnand %p1350_p12, %p1344_p1 }
  0x59   : > { %1354 = shalt.err (!%p1351_p0)
}
  0x5a   : > { %s1355_s17 = scalar_lea.vmem %s1847_s21, 128  ;;  %s1646_s12 = smov [#allocation5]  }
  0x5b   : > { %p1356_p5 = scmp.ne.s32.totalorder %s1847_s21, %s1355_s17  ;;  %s1360_s11 = sshll.u32 %s1646_s12, 4  ;;  %s1361_s11 = int_to_ptr.vmem [resolvable:$false] %s1360_s11 }
  0x5c   : > { %s1362_s9 = scalar_lea.vmem %s1361_s11, 256  ;;  %p1363_p11 = scmp.lt.s32.totalorder %s1847_s21, %s1361_s11 }
  0x5d   : > { %p1358_p9 = pnand %p1356_p5, %p1857_p7  ;;  %p1364_p13 = scmp.lt.s32.totalorder %s1362_s9, %s1355_s17 }
  0x5f   : > { %p1359_p10 = pneg %p1358_p9  ;;  %p1365_p2 = por %p1364_p13, %p1363_p11 }
  0x61   : > { %p1366_p4 = pnand %p1365_p2, %p1359_p10 }
  0x63   : > { %1369 = shalt.err (!%p1366_p4)
}
  0x64   : > { %1234 = dma.hbm_to_vmem [thread:$0]  (!%p1835_p3), %s1844_s13, 128, %s1847_s21, %s1851_s8  }
  0x65   : > { %s1370_s15 = scalar_lea.hbm %s2154_s5, 512  ;;  %p2216_p11 = scmp.ne.s32.totalorder %s2207_s28, 0 }
  0x66   : > { %p1371_p1 = scmp.ne.s32.totalorder %s2154_s5, %s1370_s15  ;;  %p1377_p6 = scmp.lt.u32.totalorder %s1370_s15, %s2154_s5 }
  0x68   : > { %p1373_p13 = pnand %p1371_p1, %p2216_p11 }
  0x6a   : > { %p1374_p10 = pneg %p1373_p13 }
  0x6c   : > { %p1379_p8 = pnand %p1377_p6, %p1374_p10 }
  0x6e   : > { %1382 = shalt.err (!%p1379_p8)
}
  0x6f   : > { %s1383_s9 = scalar_lea.vmem %s376_s14, 512  ;;  %p1391_p9 = scmp.lt.s32.totalorder %s376_s14, %s376_s14 }
  0x70   : > { %p1384_p12 = scmp.ne.s32.totalorder %s376_s14, %s1383_s9  ;;  %p1392_p2 = scmp.lt.s32.totalorder %s1383_s9, %s1383_s9 }
  0x72   : > { %p1386_p0 = pnand %p1384_p12, %p2216_p11  ;;  %p1393_p4 = por %p1392_p2, %p1391_p9 }
  0x74   : > { %p1387_p5 = pneg %p1386_p0 }
  0x76   : > { %p1394_p3 = pnand %p1393_p4, %p1387_p5 }
  0x78   : > { %1397 = shalt.err (!%p1394_p3)
}
  0x79   : > { %p2217_p1 = scmp.ne.s32.totalorder %s2205_s30, 0  ;;  %s2218_s1 = smov 8  }
  0x7a   : > { %s2219_s21 = smov 128   ;;  %s1647_s22 = smov [#allocation11]  }
  0x7b   : > { %1224 = dma.hbm_to_vmem [thread:$0]  (!%p2217_p1), %s2154_s5, 512, %s376_s14, [#allocation9], %s2219_s21, %s2219_s21, %s2218_s1  }
  0x7c   : > { %s391_s15 = sshll.u32 %s1647_s22, 4  ;;  %s1398_s11 = scalar_lea.hbm %s2156_s7, 512  ;;  %s392_s15 = int_to_ptr.vmem [resolvable:$true] %s391_s15 }
  0x7d   : > { %p1399_p3 = scmp.ne.s32.totalorder %s2156_s7, %s1398_s11  ;;  %p1405_p6 = scmp.lt.u32.totalorder %s1398_s11, %s2156_s7 }
  0x7f   : > { %p1401_p13 = pnand %p1399_p3, %p2216_p11 }
  0x81   : > { %p1402_p10 = pneg %p1401_p13 }
  0x83   : > { %p1407_p8 = pnand %p1405_p6, %p1402_p10 }
  0x85   : > { %1410 = shalt.err (!%p1407_p8)
}
  0x86   : > { %s1411_s14 = scalar_lea.vmem %s392_s15, 512  ;;  %p1419_p9 = scmp.lt.s32.totalorder %s392_s15, %s392_s15 }
  0x87   : > { %p1412_p12 = scmp.ne.s32.totalorder %s392_s15, %s1411_s14  ;;  %p1420_p2 = scmp.lt.s32.totalorder %s1411_s14, %s1411_s14 }
  0x89   : > { %p1414_p0 = pnand %p1412_p12, %p2216_p11  ;;  %p1421_p4 = por %p1420_p2, %p1419_p9 }
  0x8b   : > { %p1415_p5 = pneg %p1414_p0 }
  0x8d   : > { %p1422_p7 = pnand %p1421_p4, %p1415_p5 }
  0x8f   : > { %1425 = shalt.err (!%p1422_p7)
}
  0x90   : > { %1227 = dma.hbm_to_vmem [thread:$0]  (!%p2217_p1), %s2156_s7, 512, %s392_s15, [#allocation12], %s2219_s21, %s2219_s21, %s2218_s1  }
  0x91   : > { %s1928_s13 = scalar_lea.hbm %s2149_s0, %s1830_s26  ;;  %s412_s30 = scalar_lea.vmem [#allocation2], %s1827_s29 }
  0x92   : > { %s420_s10 = sshll.u32 %s412_s30, 4  ;;  %s2220_s22 = sand.u32 1, %s1628_s19   ;;  %s421_s10 = int_to_ptr.vmem [resolvable:$true] %s420_s10 }
  0x93   : > { %s409_s12 = scalar_lea.sflag [#allocation3], %s2220_s22  ;;  %s1426_s17 = scalar_lea.hbm %s1928_s13, 128 }
  0x94   : > { %p1427_p7 = scmp.ne.s32.totalorder %s1928_s13, %s1426_s17  ;;  %p2221_p11 = scmp.ne.s32.totalorder %s2215_s3, 0 }
  0x95   : > { %s1431_s15 = scalar_lea.hbm %s2149_s0, 256  ;;  %p1432_p1 = scmp.lt.u32.totalorder %s1928_s13, %s2149_s0 }
  0x96   : > { %p1429_p3 = pnand %p1427_p7, %p2221_p11  ;;  %p1433_p10 = scmp.lt.u32.totalorder %s1431_s15, %s1426_s17 }
  0x97   : > { %p1435_p8 = scmp.lt.u32.totalorder %s1426_s17, %s1928_s13 }
  0x98   : > { %p1430_p13 = pneg %p1429_p3  ;;  %p1434_p6 = por %p1433_p10, %p1432_p1 }
  0x9a   : > { %p1436_p12 = por %p1435_p8, %p1434_p6 }
  0x9c   : > { %p1437_p0 = pnand %p1436_p12, %p1430_p13 }
  0x9e   : > { %1440 = shalt.err (!%p1437_p0)
}
  0x9f   : > { %s1441_s14 = scalar_lea.vmem %s421_s10, 128  ;;  %s1648_s4 = smov [#allocation2]  }
  0xa0   : > { %p1442_p5 = scmp.ne.s32.totalorder %s421_s10, %s1441_s14  ;;  %s1446_s6 = sshll.u32 %s1648_s4, 4  ;;  %s1447_s6 = int_to_ptr.vmem [resolvable:$false] %s1446_s6 }
  0xa1   : > { %s1448_s28 = scalar_lea.vmem %s1447_s6, 256  ;;  %p1449_p4 = scmp.lt.s32.totalorder %s421_s10, %s1447_s6 }
  0xa2   : > { %p1444_p9 = pnand %p1442_p5, %p2221_p11  ;;  %p1450_p7 = scmp.lt.s32.totalorder %s1448_s28, %s1441_s14 }
  0xa4   : > { %p1445_p2 = pneg %p1444_p9  ;;  %p1451_p3 = por %p1450_p7, %p1449_p4 }
  0xa6   : > { %p1452_p1 = pnand %p1451_p3, %p1445_p2 }
  0xa8   : > { %1455 = shalt.err (!%p1452_p1)
}
  0xa9   : > { %p2222_p10 = scmp.ne.s32.totalorder %s2213_s24, 0  ;;  %s1954_s22 = scalar_lea.hbm %s2151_s2, %s1830_s26 }
  0xaa   : > { %s450_s17 = scalar_lea.vmem [#allocation7], %s1827_s29  ;;  %s1456_s21 = scalar_lea.hbm %s1954_s22, 128 }
  0xab   : > { %1231 = dma.hbm_to_vmem [thread:$0]  (!%p2222_p10), %s1928_s13, 128, %s421_s10, %s409_s12  }
  0xac   : > { %s458_s1 = sshll.u32 %s450_s17, 4  ;;  %p1457_p13 = scmp.ne.s32.totalorder %s1954_s22, %s1456_s21  ;;  %s459_s1 = int_to_ptr.vmem [resolvable:$true] %s458_s1 }
  0xad   : > { %s1461_s13 = scalar_lea.hbm %s2151_s2, 256  ;;  %p1462_p12 = scmp.lt.u32.totalorder %s1954_s22, %s2151_s2 }
  0xae   : > { %p1459_p6 = pnand %p1457_p13, %p2221_p11  ;;  %p1463_p0 = scmp.lt.u32.totalorder %s1461_s13, %s1456_s21 }
  0xaf   : > { %p1465_p9 = scmp.lt.u32.totalorder %s1456_s21, %s1954_s22 }
  0xb0   : > { %p1460_p8 = pneg %p1459_p6  ;;  %p1464_p5 = por %p1463_p0, %p1462_p12 }
  0xb2   : > { %p1466_p2 = por %p1465_p9, %p1464_p5 }
  0xb4   : > { %p1467_p4 = pnand %p1466_p2, %p1460_p8 }
  0xb6   : > { %1470 = shalt.err (!%p1467_p4)
}
  0xb7   : > { %s1471_s29 = scalar_lea.vmem %s459_s1, 128  ;;  %s1649_s26 = smov [#allocation7]  }
  0xb8   : > { %p1472_p7 = scmp.ne.s32.totalorder %s459_s1, %s1471_s29  ;;  %s1476_s9 = sshll.u32 %s1649_s26, 4  ;;  %s1477_s9 = int_to_ptr.vmem [resolvable:$false] %s1476_s9 }
  0xb9   : > { %s1478_s14 = scalar_lea.vmem %s1477_s9, 256  ;;  %p1479_p13 = scmp.lt.s32.totalorder %s459_s1, %s1477_s9 }
  0xba   : > { %p1474_p3 = pnand %p1472_p7, %p2221_p11  ;;  %p1480_p6 = scmp.lt.s32.totalorder %s1478_s14, %s1471_s29 }
  0xbc   : > { %p1475_p1 = pneg %p1474_p3  ;;  %p1481_p10 = por %p1480_p6, %p1479_p13 }
  0xbe   : > { %p1482_p0 = pnand %p1481_p10, %p1475_p1 }
  0xc0   : > { %1485 = shalt.err (!%p1482_p0)
}
  0xc1   : > { %p2223_p12 = scmp.ne.s32.totalorder %s2213_s24, 0  ;;  %p2224_p8 = scmp.ne.s32.totalorder %s2204_s27, 0 }
  0xc2   : > { %s1978_s3 = sand.u32 (!%p2224_p8), 1, %s1624_s18   ;;  %p2225_p11 = scmp.ne.s32.totalorder (!%p2224_p8), %s2201_s25, 0 }
  0xc3   : > { %1237 = dma.hbm_to_vmem [thread:$0]  (!%p2223_p12), %s1954_s22, 128, %s459_s1, %s1851_s8  }
  0xc4   : > { %467 = sbr.rel (%p2224_p8) target bundleno = 502 (0x1f6), region = 56  ;;  %s1981_s4 = sshll.u32 (!%p2224_p8), %s1978_s3, 3 }
  0xc5   : > { %s470_s6 = scalar_lea.sflag (!%p2224_p8), [#allocation3], %s1978_s3  ;;  %s473_s28 = scalar_lea.vmem (!%p2224_p8), [#allocation2], %s1981_s4 }
  0xcb   : > { %1595 = dma.done.wait (%p2225_p11), %s470_s6, 128  }
  0xcc   : > { %1597 = vsyncadd (%p2225_p11), %s470_s6, 4294967168  ;;  %s478_s8 = sand.u32 1, %s1747_s23   ;;  %s482_s24 = scalar_lea.vmem [#allocation5], %s1981_s4 }
  0xcd   : > { %s479_s27 = scalar_lea.sflag [#allocation6], %s478_s8 }
  0xce   : > { %1599 = dma.done.wait (%p2225_p11), %s479_s27, 256  }
  0xcf   : > { %1601 = vsyncadd (%p2225_p11), %s479_s27, 4294967040  ;;  %s491_s16 = scalar_lea.vmem [#allocation7], %s1981_s4  ;;  %p2226_p10 = scmp.eq.s32.totalorder %s1747_s23, 0 }
  0xd1   : > { %1603 = dma.done.wait (%p2226_p10), [#allocation9], 1024   ;;  %p2227_p5 = pmov %p2226_p10 }
  0xd3   : > { %1605 = vsyncadd (%p2227_p5), [#allocation9], 4294966272  ;;  %p2228_p9 = pmov %p2227_p5 }
  0xd4   : > { %p2229_p2 = pmov %p2227_p5 }
  0xd5   : > { %1607 = dma.done.wait (%p2228_p9), [#allocation12], 512  }
  0xd6   : > { %1609 = vsyncadd (%p2229_p2), [#allocation12], 4294966784  ;;  %v1650_v0 = vmov 0.0|0.0   ;;  %vm1651_vm0 = vmmov 0   ;;  %v1652_v1 = vmov 0.0   ;;  %v565_v2 = vld [vmem:[#allocation8] sm:$0xff] }
  0xd7   : > { %1176 = vmatprep.subr.bf16.mxu0 %v1650_v0  ;;  %1182 = vmatprep.subr.bf16.mxu1 %v1650_v0  ;;  %v566_v3 = vld [vmem:[#allocation8 + $0x8] sm:$0xff]  ;;  %v567_v4 = vld [vmem:[#allocation8 + $0x10] sm:$0xff]  ;;  %v568_v6 = vld [vmem:[#allocation8 + $0x18] sm:$0xff]  ;;  %vm576_vm1 = vcmask 261120   ;;  %s2230_s22 = sld [smem:[#allocation32_spill]]  ;;  %s2022_s17 = sshll.u32 %s1632_s20, 7 }
  0xd8   : > { %1151 = vmatprep.mubr.msk.f32.mxu0 %vm1651_vm0, %v1652_v1  ;;  %1162 = vmatprep.mubr.msk.f32.mxu1 %vm1651_vm0, %v1652_v1  ;;  %v1177_v5 = vpack.c.bf16 %v566_v3, %v565_v2  ;;  %v650_v7 = vld [vmem:[#allocation10] sm:$0xff]  ;;  %v651_v8 = vld [vmem:[#allocation10 + $0x8] sm:$0xff]  ;;  %v1180_v10 = vpack.c.bf16 %v568_v6, %v567_v4  ;;  %v652_v11 = vld [vmem:[#allocation10 + $0x10] sm:$0xff]  ;;  %s547_s1 = scalar_lea.vmem [#allocation13], %s1981_s4  ;;  %s2231_s13 = sld [smem:[#allocation33_spill]] }
  0xd9   : > { %v1183_v9 = vpack.c.bf16 %v651_v8, %v650_v7  ;;  %v653_v12 = vld [vmem:[#allocation10 + $0x18] sm:$0xff]  ;;  %v734_v13 = vld [vmem:[#allocation11] sm:$0xff]  ;;  %v735_v14 = vld [vmem:[#allocation11 + $0x8] sm:$0xff]  ;;  %s846_s21 = sshll.u32 %s547_s1, 4  ;;  %s554_s10 = scalar_lea.vmem [#allocation14], %s1981_s4  ;;  %s2035_s21 = int_to_ptr.vmem [resolvable:$true] %s846_s21 }
  0xda   : > { %1178 = vmatpush3.bf16.msra.mxu0 %v1177_v5  ;;  %v1186_v15 = vpack.c.bf16 %v653_v12, %v652_v11  ;;  %v562_v16 = vld [vmem:[%s473_s28] sm:$0xff]  ;;  %v1189_v17 = vpack.c.bf16 %v735_v14, %v734_v13  ;;  %v563_v20 = vld [vmem:[%s482_s24] sm:$0xff]  ;;  %s860_s12 = sshll.u32 %s554_s10, 4  ;;  %s2232_s29 = sld [smem:[#allocation28_spill]]  ;;  %s2043_s12 = int_to_ptr.vmem [resolvable:$true] %s860_s12 }
  0xdb   : > { %1179 = vmatprep.subr.bf16.mxu0 %v1650_v0  ;;  %1184 = vmatpush3.bf16.msra.mxu1 %v1183_v9  ;;  %v736_v18 = vld [vmem:[#allocation11 + $0x10] sm:$0xff]  ;;  %v737_v19 = vld [vmem:[#allocation11 + $0x18] sm:$0xff]  ;;  %s2233_s20 = sld [smem:[#allocation35_spill]]  ;;  %s2235_s24 = sld [smem:[#allocation36_spill]] }
  0xdc   : > { %1185 = vmatprep.subr.bf16.mxu1 %v1650_v0  ;;  %v1192_v21 = vpack.c.bf16 %v737_v19, %v736_v18  ;;  %v564_v22 = vld [vmem:[%s491_s16] sm:$0xff]  ;;  %s822_s25 = scalar_lea.sflag [#allocation4], %s1978_s3  ;;  %s1486_s30 = scalar_lea.vmem %s2035_s21, 128 }
  0xdd   : > { %v1114_v23 = vld [vmem:[%s2230_s22] ss:$0 sm:$0xff]  ;;  %p1487_p4 = scmp.ne.s32.totalorder %s2035_s21, %s1486_s30  ;;  %s1653_s22 = smov [#allocation13]  }
  0xde   : > { %1181 = vmatpush3.bf16.msra.mxu0 %v1180_v10  ;;  %v1116_v24 = vld [vmem:[%s2231_s13] ss:$0 sm:$0xff]  ;;  %s1490_s15 = sshll.u32 %s1653_s22, 4  ;;  %s1491_s15 = int_to_ptr.vmem [resolvable:$false] %s1490_s15 }
  0xdf   : > { %1188 = vmatprep.subr.bf16.mxu0 %v1650_v0  ;;  %1187 = vmatpush3.bf16.msra.mxu1 %v1186_v15  ;;  %s1492_s11 = scalar_lea.vmem %s1491_s15, 256  ;;  %p1493_p13 = scmp.lt.s32.totalorder %s2035_s21, %s1491_s15 }
  0xe0   : > { %p2236_p7 = scmp.ne.s32.totalorder %s2232_s29, 0  ;;  %p1494_p6 = scmp.lt.s32.totalorder %s1492_s11, %s1486_s30 }
  0xe1   : > { %1152 = vmatmul.mubr.msk.f32.vlgmr.msra.gmra.mrb[0].mxu0 %vm576_vm1, %v562_v16  ;;  %s2234_s14 = smov %s2233_s20  ;;  %s2033_s6 = scalar_lea.hbm %s2233_s20, %s2022_s17 }
  0xe2   : > { %1190 = vmatpush3.bf16.msra.mxu0 %v1189_v17  ;;  %1163 = vmatmul.mubr.msk.f32.vlgmr.msra.gmra.mrb[0].mxu1 %vm576_vm1, %v563_v20  ;;  %s2041_s16 = scalar_lea.hbm %s2235_s24, %s2022_s17  ;;  %p1488_p3 = pnand %p1487_p4, %p2236_p7 }
  0xe3   : > { %1191 = vmatprep.subr.bf16.mxu0 %v1650_v0  ;;  %1173 = vmatprep.mubr.msk.f32.mxu0 %vm1651_vm0, %v1652_v1  ;;  %p1495_p0 = por %p1494_p6, %p1493_p13 }
  0xe4   : > { %p1489_p1 = pneg %p1488_p3 }
  0xe6   : > { %1193 = vmatpush3.bf16.msra.mxu0 %v1192_v21  ;;  %p1496_p12 = pnand %p1495_p0, %p1489_p1 }
  0xe9   : > { %1174 = vmatmul.mubr.msk.f32.vlgmr.msra.gmra.mrb[2].mxu0 %vm576_vm1, %v564_v22 }
 0x1b4   : > { %v646_v25 = vpop.f32.mrb[0].mxu0 }
 0x1b5   : > { %v647_v26 = vadd.f32 %v1114_v23, %v646_v25  ;;  %v1153_v27 = vpop.f32.mrb[1].mxu0  ;;  %v730_v28 = vpop.f32.mrb[0].mxu1 }
 0x1b6   : > { %v731_v29 = vadd.f32 %v1116_v24, %v730_v28  ;;  %v1164_v30 = vpop.f32.mrb[1].mxu1 }
 0x1b7   : > { %818 = vst.msk [vmem:[%s547_s1] sm:$0xff] %vm576_vm1, %v647_v26 }
 0x1b8   : > { %819 = vst.msk [vmem:[%s554_s10] sm:$0xff] %vm576_vm1, %v731_v29 }
 0x1b9   : > { %1499 = shalt.err (!%p1496_p12)
}
 0x1ba   : > { %s1500_s3 = scalar_lea.hbm %s2033_s6, 128  ;;  %s1504_s10 = scalar_lea.hbm %s2234_s14, 256 }
 0x1bb   : > { %p1501_p8 = scmp.ne.s32.totalorder %s2033_s6, %s1500_s3  ;;  %p1505_p5 = scmp.lt.u32.totalorder %s2033_s6, %s2234_s14 }
 0x1bc   : > { %p1506_p9 = scmp.lt.u32.totalorder %s1504_s10, %s1500_s3  ;;  %p1508_p4 = scmp.lt.u32.totalorder %s1500_s3, %s2033_s6 }
 0x1bd   : > { %p1502_p11 = pnand %p1501_p8, %p2236_p7 }
 0x1be   : > { %p1507_p2 = por %p1506_p9, %p1505_p5 }
 0x1bf   : > { %p1503_p10 = pneg %p1502_p11 }
 0x1c0   : > { %p1509_p3 = por %p1508_p4, %p1507_p2 }
 0x1c2   : > { %p1510_p1 = pnand %p1509_p3, %p1503_p10 }
 0x1c4   : > { %1513 = shalt.err (!%p1510_p1)
}
 0x1c5   : > { %1212 = dma.vmem_to_hbm [thread:$0]  (%p2236_p7), %s2035_s21, 128, %s2033_s6, %s822_s25  }
 0x1c6   : > { %s2071_s20 = scalar_lea.sflag [#allocation15], %s478_s8  ;;  %s1514_s28 = scalar_lea.vmem %s2043_s12, 128 }
 0x1c7   : > { %p1515_p13 = scmp.ne.s32.totalorder %s2043_s12, %s1514_s28  ;;  %s1654_s27 = smov [#allocation14]  }
 0x1c8   : > { %s1518_s30 = sshll.u32 %s1654_s27, 4  ;;  %s1519_s30 = int_to_ptr.vmem [resolvable:$false] %s1518_s30 }
 0x1c9   : > { %p1516_p6 = pnand %p1515_p13, %p2236_p7  ;;  %s1520_s22 = scalar_lea.vmem %s1519_s30, 256 }
 0x1ca   : > { %p1521_p12 = scmp.lt.s32.totalorder %s2043_s12, %s1519_s30  ;;  %p1522_p8 = scmp.lt.s32.totalorder %s1520_s22, %s1514_s28 }
 0x1cb   : > { %p1517_p0 = pneg %p1516_p6 }
 0x1cc   : > { %p1523_p11 = por %p1522_p8, %p1521_p12 }
 0x1ce   : > { %p1524_p10 = pnand %p1523_p11, %p1517_p0 }
 0x1d0   : > { %1527 = shalt.err (!%p1524_p10)
}
 0x1d1   : > { %s1528_s23 = scalar_lea.hbm %s2041_s16, 128  ;;  %s1532_s6 = scalar_lea.hbm %s2235_s24, 256 }
 0x1d2   : > { %p1529_p5 = scmp.ne.s32.totalorder %s2041_s16, %s1528_s23  ;;  %p1533_p4 = scmp.lt.u32.totalorder %s2041_s16, %s2235_s24 }
 0x1d3   : > { %p1534_p3 = scmp.lt.u32.totalorder %s1532_s6, %s1528_s23  ;;  %p1536_p13 = scmp.lt.u32.totalorder %s1528_s23, %s2041_s16 }
 0x1d4   : > { %p1530_p9 = pnand %p1529_p5, %p2236_p7 }
 0x1d5   : > { %p1535_p1 = por %p1534_p3, %p1533_p4 }
 0x1d6   : > { %p1531_p2 = pneg %p1530_p9 }
 0x1d7   : > { %p1537_p6 = por %p1536_p13, %p1535_p1 }
 0x1d9   : > { %p1538_p0 = pnand %p1537_p6, %p1531_p2 }
 0x1db   : > { %1541 = shalt.err (!%p1538_p0)
}
 0x1dc   : > { %1213 = dma.vmem_to_hbm [thread:$0]  (%p2236_p7), %s2043_s12, 128, %s2041_s16, %s2071_s20   ;;  %v814_v32 = vpop.f32.mrb[2].mxu0 }
 0x1dd   : > { %s2237_s1 = sld [smem:[#allocation34_spill]]  ;;  %s561_s13 = scalar_lea.vmem [#allocation16], %s1981_s4  ;;  %v1175_v34 = vpop.f32.mrb[3].mxu0 }
 0x1de   : > { %s874_s10 = sshll.u32 %s561_s13, 4  ;;  %s2238_s28 = sld [smem:[#allocation37_spill]]  ;;  %s875_s10 = int_to_ptr.vmem [resolvable:$true] %s874_s10 }
 0x1df   : > { %s1542_s30 = scalar_lea.vmem %s875_s10, 128  ;;  %s1655_s12 = smov [#allocation16]  }
 0x1e0   : > { %p1543_p12 = scmp.ne.s32.totalorder %s875_s10, %s1542_s30  ;;  %s1546_s16 = sshll.u32 %s1655_s12, 4  ;;  %s1547_s16 = int_to_ptr.vmem [resolvable:$false] %s1546_s16 }
 0x1e1   : > { %s1548_s4 = scalar_lea.vmem %s1547_s16, 256  ;;  %p1549_p10 = scmp.lt.s32.totalorder %s875_s10, %s1547_s16 }
 0x1e2   : > { %p1544_p8 = pnand %p1543_p12, %p2236_p7  ;;  %p1550_p5 = scmp.lt.s32.totalorder %s1548_s4, %s1542_s30 }
 0x1e3   : > { %v1118_v31 = vld [vmem:[%s2237_s1] ss:$0 sm:$0xff] }
 0x1e4   : > { %v815_v33 = vadd.f32 %v1118_v31, %v814_v32  ;;  %s2103_s27 = scalar_lea.hbm %s2238_s28, %s2022_s17  ;;  %p1545_p11 = pneg %p1544_p8 }
 0x1e5   : > { %p1551_p9 = por %p1550_p5, %p1549_p10 }
 0x1e6   : > { %820 = vst.msk [vmem:[%s561_s13] sm:$0xff] %vm576_vm1, %v815_v33 }
 0x1e7   : > { %p1552_p2 = pnand %p1551_p9, %p1545_p11 }
 0x1e9   : > { %1555 = shalt.err (!%p1552_p2)
}
 0x1ea   : > { %s1556_s17 = scalar_lea.hbm %s2103_s27, 128  ;;  %s1560_s8 = scalar_lea.hbm %s2238_s28, 256 }
 0x1eb   : > { %p1557_p4 = scmp.ne.s32.totalorder %s2103_s27, %s1556_s17  ;;  %p1561_p13 = scmp.lt.u32.totalorder %s2103_s27, %s2238_s28 }
 0x1ec   : > { %p1562_p6 = scmp.lt.u32.totalorder %s1560_s8, %s1556_s17  ;;  %p1564_p12 = scmp.lt.u32.totalorder %s1556_s17, %s2103_s27 }
 0x1ed   : > { %p1558_p3 = pnand %p1557_p4, %p2236_p7 }
 0x1ee   : > { %p1563_p0 = por %p1562_p6, %p1561_p13 }
 0x1ef   : > { %p1559_p1 = pneg %p1558_p3 }
 0x1f0   : > { %p1565_p8 = por %p1564_p12, %p1563_p0 }
 0x1f2   : > { %p1566_p11 = pnand %p1565_p8, %p1559_p1 }
 0x1f4   : > { %1569 = shalt.err (!%p1566_p11)
}
 0x1f5   : > { %1214 = dma.vmem_to_hbm [thread:$0]  (%p2236_p7), %s875_s10, 128, %s2103_s27, %s2071_s20  }
 0x1f6 PF: > { %s2239_s25 = sld [smem:[#allocation23_spill]]  ;;  %s2240_s15 = sld [smem:[#allocation26_spill]] }
 0x1f7   : > { %s2241_s11 = sld [smem:[#allocation25_spill]] }
 0x1fc   : > { %s886_s3 = sand.u32 1, %s2239_s25   ;;  %p2242_p10 = scmp.ne.s32.totalorder %s2240_s15, 0 }
 0x1fd   : > { %p2243_p5 = scmp.ge.s32.totalorder %s2241_s11, 2  ;;  %s887_s1 = scalar_lea.sflag [#allocation4], %s886_s3 }
 0x1ff   : > { %p1239_p9 = pnand %p2243_p5, %p2242_p10 }
 0x201   : > { %1611 = dma.done.wait (!%p1239_p9), %s887_s1, 128  }
 0x202   : > { %1613 = vsyncadd (!%p1239_p9), %s887_s1, 4294967168  ;;  %s2244_s13 = sadd.s32 4294967294, %s2241_s11  }
 0x203   : > { %s895_s26 = sand.u32 1, %s2244_s13  }
 0x204   : > { %s896_s9 = scalar_lea.sflag [#allocation15], %s895_s26 }
 0x205   : > { %1615 = dma.done.wait (!%p1239_p9), %s896_s9, 256  }
 0x206   : > { %1617 = vsyncadd (!%p1239_p9), %s896_s9, 4294967040  ;;  %s36_s22 = sadd.s32 1, %s2241_s11   ;;  %s2245_s29 = sld [smem:[#allocation29_spill]] }
 0x207   : > { %p33_p7 = scmp.ge.s32.totalorder %s36_s22, 4   ;;  %s2246_s20 = sld [smem:[#allocation24_spill]] }
 0x208   : > { %s2247_s21 = sld [smem:[#allocation27_spill]]  ;;  %s2248_s17 = smov %s1624_s18 }
 0x209   : > { %s2249_s18 = smov %s1628_s19  ;;  %35 = sbr.rel (!%p33_p7) target bundleno = 21 (0x15), region = 169 }
 0x20c   : > { %s2250_s19 = smov %s2245_s29 }
 0x210   :  { %910 = vsyncpa [#allocation3], 1 }
 0x211   :  { %912 = vsyncpa [#allocation3 + $0x1], 1 }
 0x212   :  { %913 = vsyncpa [#allocation6], 1 }
 0x213   :  { %915 = vsyncpa [#allocation6 + $0x1], 1 }
 0x214   :  { %916 = vsyncpa [#allocation9], 1 }
 0x215   :  { %917 = vsyncpa [#allocation12], 1 }
 0x216   :  { %918 = vsyncpa [#allocation4], 1 }
 0x217   :  { %920 = vsyncpa [#allocation4 + $0x1], 1 }
 0x218   :  { %921 = vsyncpa [#allocation15], 1 }
 0x219   :  { %923 = vsyncpa [#allocation15 + $0x1], 1 }

</bundles_post_ra>
